<compile_context>
chip_gen: v7x
topology: tpu7x:2x2x1
jax: 0.10.0
libtpu: 0.0.40
codegen_flags: <defaults>
</compile_context>

<pallas_src>
import functools

import jax
import jax.numpy as jnp
from jax.experimental import pallas as pl
from jax.experimental.pallas import tpu as pltpu

_NEG_BIG = -1e30  # bias padding -> padded tag columns get ~0 probability
_LANES = 128      # TPU lane width
_SUBLANES = 8     # TPU sublane width (f32)


def _round_up(n, m):
    return pl.cdiv(n, m) * m


def _softmax_decoder_kernel(x_ref, w_ref, b_ref, scores_ref):
    # x_ref:      (TM, H)      float32   row tile of encoded activations
    # w_ref:      (H,  T_pad)  float32   resident across the whole grid
    # b_ref:      (1,  T_pad)  float32   resident across the whole grid
    # scores_ref: (TM, T_pad)  float32   lane-dense softmax output
    x = x_ref[...]
    w = w_ref[...]
    b = b_ref[...]

    # Linear: hidden2tag (MXU matmul, f32 accumulate) + bias broadcast.
    logits = jnp.dot(x, w, preferred_element_type=jnp.float32) + b

    # Numerically-stable softmax over the (padded) tag axis.  Padded columns
    # have logits ~ -1e30 -> exp underflows to 0 -> they contribute nothing.
    m = jnp.max(logits, axis=-1, keepdims=True)
    e = jnp.exp(logits - m)
    denom = jnp.sum(e, axis=-1, keepdims=True)
    # approx=True -> EUP vrcp slot; same positive factor for the whole row, so
    # the relative ordering (and hence the wrapper argmax) is unchanged.
    scores_ref[...] = e * pl.reciprocal(denom, approx=True)


@jax.jit
def softmax_decoder_forward(x, weight, bias):
    """x: (B, S, H) float32; weight: (H, T); bias: (T,).

    Returns (output, scores) matching the PyTorch module:
      output: (B, S)    int32    argmax tag ids
      scores: (B, S, T) float32  softmax probabilities
    """
    B, S, H = x.shape
    T = weight.shape[1]
    M = B * S

    # Lane-dense tag axis: pad T up to a multiple of 128.
    T_pad = _round_up(T, _LANES)
    # Row tile: big enough to pipeline well, multiple of 8 sublanes, and
    # small enough (with double buffering) for v7x's tighter VMEM budget.
    TM = min(512, _round_up(M, _SUBLANES))
    M_pad = _round_up(M, TM)

    # Dropout(p=0.0) is the identity -> x is used directly.
    # TODO(synk): train-time dropout (p > 0) is not implemented in-kernel.
    x2 = x.reshape(M, H).astype(jnp.float32)
    if M_pad != M:
        # Pad ragged tail rows so every grid step stores a full, unmasked tile;
        # padded rows are sliced off below.
        x2 = jnp.pad(x2, ((0, M_pad - M), (0, 0)))

    w2 = weight.astype(jnp.float32)
    b2 = bias.astype(jnp.float32).reshape(1, T)
    if T_pad != T:
        w2 = jnp.pad(w2, ((0, 0), (0, T_pad - T)))                      # zero cols
        b2 = jnp.pad(b2, ((0, 0), (0, T_pad - T)),
                     constant_values=_NEG_BIG)                          # -inf-ish bias

    grid = (M_pad // TM,)

    scores_pad = pl.pallas_call(
        _softmax_decoder_kernel,
        out_shape=jax.ShapeDtypeStruct((M_pad, T_pad), jnp.float32),
        grid=grid,
        in_specs=[
            pl.BlockSpec((TM, H), lambda i: (i, 0)),       # streamed row tiles
            pl.BlockSpec((H, T_pad), lambda i: (0, 0)),    # resident weight
            pl.BlockSpec((1, T_pad), lambda i: (0, 0)),    # resident bias
        ],
        out_specs=pl.BlockSpec((TM, T_pad), lambda i: (i, 0)),
        compiler_params=pltpu.CompilerParams(
            dimension_semantics=("parallel",),             # shard rows across TCs
        ),
    )(x2, w2, b2)

    # Drop row/tag padding, restore (B, S, T); argmax in the wrapper via XLA
    # (softmax is monotone, so this equals argmax of the in-kernel logits).
    scores = scores_pad[:M, :T].reshape(B, S, T)
    output = jnp.argmax(scores, axis=-1).astype(jnp.int32)
    return output, scores


if __name__ == "__main__":
    # Tag vocab for the NER decoder (defines num_tags).
    tags = ["O", "B-PER", "I-PER", "B-LOC", "I-LOC"]
    tag2idx = {t: i for i, t in enumerate(tags)}
    num_tags = len(tag2idx)

    batch, seq, hidden_dim = 2, 8, 32

    key = jax.random.PRNGKey(0)
    kx, kw, kb = jax.random.split(key, 3)

    # Deterministic "parameters" of nn.Linear(hidden_dim, num_tags).
    # (torch stores weight as [num_tags, hidden]; we keep [hidden, num_tags].)
    bound = 1.0 / (hidden_dim ** 0.5)
    weight = jax.random.uniform(
        kw, (hidden_dim, num_tags), jnp.float32, minval=-bound, maxval=bound
    )
    bias = jax.random.uniform(
        kb, (num_tags,), jnp.float32, minval=-bound, maxval=bound
    )

    # Encoded input (data['encoded']).  Dropout p=0.0 -> identity.
    x = jax.random.normal(kx, (batch, seq, hidden_dim), jnp.float32)

    output, scores = softmax_decoder_forward(x, weight, bias)
    jax.block_until_ready((output, scores))

    # Reference check in plain JAX.
    logits_ref = x @ weight + bias
    scores_ref = jax.nn.softmax(logits_ref, axis=-1)
    output_ref = jnp.argmax(scores_ref, axis=-1).astype(jnp.int32)
    # approx reciprocal (EUP vrcp) loosens the score tolerance slightly.
    assert jnp.allclose(scores, scores_ref, atol=1e-3, rtol=1e-3), "scores mismatch"
    assert jnp.array_equal(output, output_ref), "argmax mismatch"
    assert scores.shape == (batch, seq, num_tags)
    assert output.shape == (batch, seq)

    print("KERNEL_OK")
</pallas_src>

<mosaic_0001>
module attributes {stable_mosaic.version = 11 : i64} {
  func.func @_softmax_decoder_kernel(%arg0: i32, %arg1: memref<16x32xf32, #tpu.memory_space<vmem>>, %arg2: memref<32x128xf32, #tpu.memory_space<vmem>>, %arg3: memref<1x128xf32, #tpu.memory_space<vmem>>, %arg4: memref<16x128xf32, #tpu.memory_space<vmem>>) attributes {dimension_semantics = [#tpu.dimension_semantics<parallel>], iteration_bounds = array<i64: 1>, scalar_prefetch = 0 : i64, scratch_operands = 0 : i64, tpu.core_type = #tpu.core_type<tc>, window_params = [{transform_indices = @transform_0, window_bounds = array<i64: 16, 32>}, {pipeline_mode = #tpu.pipeline_mode<synchronous>, transform_indices = @transform_1, window_bounds = array<i64: 32, 128>}, {pipeline_mode = #tpu.pipeline_mode<synchronous>, transform_indices = @transform_2, window_bounds = array<i64: 1, 128>}, {transform_indices = @transform_3, window_bounds = array<i64: 16, 128>}]} {
    %c0 = arith.constant 0 : index
    %c0_0 = arith.constant 0 : index
    %0 = vector.load %arg1[%c0, %c0_0] : memref<16x32xf32, #tpu.memory_space<vmem>>, vector<16x32xf32>
    %c0_1 = arith.constant 0 : index
    %c0_2 = arith.constant 0 : index
    %1 = vector.load %arg2[%c0_1, %c0_2] : memref<32x128xf32, #tpu.memory_space<vmem>>, vector<32x128xf32>
    %c0_3 = arith.constant 0 : index
    %c0_4 = arith.constant 0 : index
    %2 = vector.load %arg3[%c0_3, %c0_4] : memref<1x128xf32, #tpu.memory_space<vmem>>, vector<1x128xf32>
    %cst = arith.constant dense<0.000000e+00> : vector<16x128xf32>
    %3 = tpu.matmul %0, %1, %cst {dimension_numbers = #tpu.dot_dimension_numbers<[1], [0], [0], [1], [0, 0, 1, 1], [], []>} : vector<16x32xf32>, vector<32x128xf32>, vector<16x128xf32> -> vector<16x128xf32>
    %4 = vector.broadcast %2 : vector<1x128xf32> to vector<16x128xf32>
    %5 = arith.addf %3, %4 : vector<16x128xf32>
    %cst_5 = arith.constant dense<0xFF800000> : vector<16xf32>
    %6 = vector.multi_reduction <maximumf>, %5, %cst_5 [1] : vector<16x128xf32> to vector<16xf32>
    %7 = vector.shape_cast %6 : vector<16xf32> to vector<16x1xf32>
    %8 = vector.broadcast %7 : vector<16x1xf32> to vector<16x128xf32>
    %9 = arith.subf %5, %8 : vector<16x128xf32>
    %10 = math.exp %9 : vector<16x128xf32>
    %cst_6 = arith.constant dense<0.000000e+00> : vector<16xf32>
    %11 = vector.multi_reduction <add>, %10, %cst_6 [1] : vector<16x128xf32> to vector<16xf32>
    %12 = vector.shape_cast %11 : vector<16xf32> to vector<16x1xf32>
    %13 = tpu.reciprocal %12 {approx = true} : vector<16x1xf32> -> vector<16x1xf32>
    %14 = vector.broadcast %13 : vector<16x1xf32> to vector<16x128xf32>
    %15 = arith.mulf %10, %14 : vector<16x128xf32>
    %c0_7 = arith.constant 0 : index
    %c0_8 = arith.constant 0 : index
    %16 = vector.load %arg4[%c0_7, %c0_8] : memref<16x128xf32, #tpu.memory_space<vmem>>, vector<16x128xf32>
    tpu.vector_store %arg4[%c0_7, %c0_8], %15 {strides = array<i32>} : memref<16x128xf32, #tpu.memory_space<vmem>>, vector<16x128xf32>,
    return
  }
  func.func @transform_0(%arg0: i32) -> (i32, i32) {
    %c0_i32 = arith.constant 0 : i32
    %c0_i32_0 = arith.constant 0 : i32
    return %arg0, %c0_i32 : i32, i32
  }
  func.func @transform_1(%arg0: i32) -> (i32, i32) {
    %c0_i32 = arith.constant 0 : i32
    %c0_i32_0 = arith.constant 0 : i32
    %c0_i32_1 = arith.constant 0 : i32
    return %c0_i32, %c0_i32_0 : i32, i32
  }
  func.func @transform_2(%arg0: i32) -> (i32, i32) {
    %c0_i32 = arith.constant 0 : i32
    %c0_i32_0 = arith.constant 0 : i32
    %c0_i32_1 = arith.constant 0 : i32
    return %c0_i32, %c0_i32_0 : i32, i32
  }
  func.func @transform_3(%arg0: i32) -> (i32, i32) {
    %c0_i32 = arith.constant 0 : i32
    %c0_i32_0 = arith.constant 0 : i32
    return %arg0, %c0_i32 : i32, i32
  }
}

</mosaic_0001>

<bundles_post_ra>
// kernel: softmax_decoder_forward.1
= control target key start
LH: loop header
LB: loop body
LE: loop exit
PB: predicated region body
PF: predicated region fallthrough
CT: control target
= control target key end

     0   :  { %vm27_vm0 = vcmask 261120   ;;  %s216_s1 = inlined_call_operand.vmem [shape: f32[32,128], index: 1, kind: input, shape index: {}]   ;;  %s217_s0 = inlined_call_operand.vmem [shape: f32[16,32], index: 0, kind: input, shape index: {}]   ;;  %s218_s2 = inlined_call_operand.vmem [shape: f32[1,128], index: 2, kind: input, shape index: {}]   ;;  %s219_s3 = inlined_call_operand.vmem [shape: f32[16,128], index: 3, kind: output, shape index: {}]  }
   0x1   :  { %v16_v0 = vld [vmem:[%s216_s1] sm:$0xff]  ;;  %v17_v1 = vld [vmem:[%s216_s1 + $0x8] sm:$0xff]  ;;  %v18_v2 = vld [vmem:[%s216_s1 + $0x10] sm:$0xff] }
   0x2   :  { %v153_v3 = vpack.c.bf16 %v17_v1, %v16_v0  ;;  %v19_v4 = vld [vmem:[%s216_s1 + $0x18] sm:$0xff]  ;;  %v14_v5 = vld [vmem:[%s217_s0] sm:$0xff]  ;;  %v15_v7 = vld [vmem:[%s217_s0 + $0x8] sm:$0xff] }
   0x3   :  { %v157_v6 = vpack.c.bf16 %v19_v4, %v18_v2  ;;  %150 = vmatprep.mubr.msk.f32.mxu0 %vm27_vm0, %v14_v5  ;;  %v133_v8 = vld [vmem:[%s218_s2] ss:$0 sm:$0xff] }
   0x4   :  { %154 = vmatprep.subr.bf16.mxu0 %v153_v3 }
   0x5   :  { %156 = vmatpush3.bf16.msra.mxu0 %v153_v3 }
   0x6   :  { %158 = vmatprep.subr.bf16.mxu0 %v157_v6 }
   0x9   :  { %160 = vmatpush3.bf16.msra.mxu0 %v157_v6 }
   0xc   :  { %151 = vmatmul.mubr.msk.f32.vlgmr.msra.gmra.mrb[0].mxu0 %vm27_vm0, %v15_v7 }
  0xdf   :  { %v152_v9 = vpop.f32.mrb[0].mxu0 }
  0xe0   :  { %v100_v10 = vpop.f32.mrb[1].mxu0  ;;  %v106_v12 = vadd.f32 %v152_v9, %v133_v8 }
  0xe1   :  { %v101_v11 = vadd.f32 %v133_v8, %v100_v10 }
  0xe3   :  { %109 = vmax.xlane.f32.xlu0 %v101_v11 }
  0xe7   :  { %111 = vmax.xlane.f32.xlu0 %v106_v12 }
 0x170   :  { %v110_v13 = vpop.xlane.xlu0 %109 }
 0x171   :  { %v113_v14 = vsub.f32 %v101_v11, %v110_v13 }
 0x173   :  { %v115_v15 = vmul.f32 1.442695, %v113_v14 }
 0x174   :  { %v112_v16 = vpop.xlane.xlu0 %111 }
 0x175   :  { %161 = vpow2.f32 %v115_v15  ;;  %v114_v17 = vsub.f32 %v106_v12, %v112_v16 }
 0x177   :  { %v117_v18 = vmul.f32 1.442695, %v114_v17 }
 0x179   :  { %163 = vpow2.f32 %v117_v18 }
 0x17f   :  { %v162_v19 = vpop.eup %161 }
 0x180   :  { %119 = vadd.xlane.f32.xlu1 %v162_v19 }
 0x183   :  { %v164_v20 = vpop.eup %163 }
 0x184   :  { %121 = vadd.xlane.f32.xlu1 %v164_v20 }
 0x20d   :  { %v120_v21 = vpop.xlane.xlu1 %119 }
 0x20e   :  { %165 = vrcp.f32 %v120_v21 }
 0x211   :  { %v122_v22 = vpop.xlane.xlu1 %121 }
 0x212   :  { %167 = vrcp.f32 %v122_v22 }
 0x218   :  { %v166_v23 = vpop.eup %165 }
 0x219   :  { %v125_v24 = vmul.f32 %v166_v23, %v162_v19 }
 0x21b   :  { %127 = vst [vmem:[%s219_s3] sm:$0xff] %v125_v24 }
 0x21c   :  { %v168_v25 = vpop.eup %167 }
 0x21d   :  { %v126_v26 = vmul.f32 %v168_v25, %v164_v20 }
 0x21f   :  { %128 = vst [vmem:[%s219_s3 + $0x8] sm:$0xff] %v126_v26 }

</bundles_post_ra>
